<compile_context>
chip_gen: v6e
topology: v6e:2x2x1
jax: 0.10.0
libtpu: 0.0.40
codegen_flags: <defaults>
</compile_context>

<pallas_src>
import numpy as np
import jax
import jax.numpy as jnp
from jax import lax
from jax.experimental import pallas as pl
from jax.experimental.pallas import tpu as pltpu

TWO_PI = 2.0 * np.pi
BN_EPS = 1e-5
LEAKY_SLOPE = 0.1


def _round_up(v, m):
    return ((v + m - 1) // m) * m


def _choose_tm(B, cap=4096):
    """Pick (tm, b_pad): tm multiple of 8 (or == B for tiny B), tm | b_pad when
    possible (avoids a full jnp.pad copy of x), and >= 2 grid steps when the
    batch allows (so v7x's 2 TensorCores both get work)."""
    if B < 16:
        return B, B                       # single full-dim block; no padding needed
    b_pad = _round_up(B, 8)
    steps = max(2, -(-b_pad // cap))      # >= 2 steps, obey the tile cap
    tm = _round_up(-(-b_pad // steps), 8)
    t = tm
    for _ in range(256):                  # prefer a tile that divides b_pad exactly
        if t >= 8 and b_pad % t == 0:
            return t, b_pad
        t -= 8
    return tm, _round_up(b_pad, tm)       # fallback: accept a small tail pad


# --------------------------------------------------------------------------
# Kernel
# --------------------------------------------------------------------------
def _network1_kernel(x_ref, w1_ref, b1_ref, w3_ref, b3_ref, o_ref):
    # linear_1 on the MXU (x cast in-kernel to the weight dtype, f32 accumulate).
    xb = x_ref[...].astype(w1_ref.dtype)
    h = jnp.dot(xb, w1_ref[...], preferred_element_type=jnp.float32)
    h = h + b1_ref[...]

    # LeakyReLU(0.1): valid as max(h, 0.1*h) since slope in (0, 1).
    h = jnp.maximum(h, LEAKY_SLOPE * h)

    # BatchNorm1d (eval) is folded into w3'/b3' at parameter-prep time.
    # Dropout(0.25) is the identity in eval mode.

    # linear_3 (+ folded BN) on the MXU, f32 bias.
    y = jnp.dot(h.astype(w3_ref.dtype), w3_ref[...],
                preferred_element_type=jnp.float32)
    y = y + b3_ref[...]

    # sigmoid(y) * 2*pi  ==  pi * (1 + tanh(y/2))  -> single EUP op.
    o_ref[...] = (jnp.pi * (1.0 + jnp.tanh(0.5 * y))).astype(o_ref.dtype)


# --------------------------------------------------------------------------
# Wrapper
# --------------------------------------------------------------------------
def network_1_forward(x, prepared, *, tm_cap=4096):
    """x: (B, input_size) float32. prepared: output of prepare_params()."""
    B, in_size = x.shape
    w1, b1 = prepared["w1"], prepared["b1"]
    w3, b3 = prepared["w3_folded"], prepared["b3_folded"]
    n = w1.shape[1]
    out_size = w3.shape[1]

    tm, b_pad = _choose_tm(B, tm_cap)
    if b_pad != B:
        # TODO(synk): a dedicated tail call would avoid this full-copy pad; the
        # tm chooser already avoids it whenever a dividing tile exists.
        x = jnp.pad(x, ((0, b_pad - B), (0, 0)))

    out = pl.pallas_call(
        _network1_kernel,
        out_shape=jax.ShapeDtypeStruct((b_pad, out_size), jnp.float32),
        grid_spec=pltpu.PrefetchScalarGridSpec(
            num_scalar_prefetch=0,
            grid=(b_pad // tm,),
            in_specs=[
                pl.BlockSpec((tm, in_size), lambda i: (i, 0)),   # x: tiled on batch (f32)
                pl.BlockSpec((in_size, n), lambda i: (0, 0)),    # W1: VMEM-resident
                pl.BlockSpec((1, n), lambda i: (0, 0)),          # b1 (f32)
                pl.BlockSpec((n, out_size), lambda i: (0, 0)),   # W3' (BN folded)
                pl.BlockSpec((1, out_size), lambda i: (0, 0)),   # b3' (f32)
            ],
            out_specs=pl.BlockSpec((tm, out_size), lambda i: (i, 0)),
        ),
        compiler_params=pltpu.CompilerParams(
            dimension_semantics=("parallel",),      # shards batch across TCs on v7x
            vmem_limit_bytes=32 * 1024 * 1024,      # explicit (v5e default is 16 MiB)
        ),
    )(x, w1, b1, w3, b3)

    return out[:B] if b_pad != B else out


# --------------------------------------------------------------------------
# Parameter construction / prep
# --------------------------------------------------------------------------
def init_params(key, input_size, n, output_size):
    """PyTorch-like init; BN stats made non-trivial to exercise the BN fold."""
    ks = jax.random.split(key, 8)
    lim1 = 1.0 / np.sqrt(input_size)
    lim3 = 1.0 / np.sqrt(n)
    return {
        # weights stored pre-transposed: (in_features, out_features)
        "w1": jax.random.uniform(ks[0], (input_size, n), jnp.float32, -lim1, lim1),
        "b1": jax.random.uniform(ks[1], (1, n), jnp.float32, -lim1, lim1),
        "w3": jax.random.uniform(ks[2], (n, output_size), jnp.float32, -lim3, lim3),
        "b3": jax.random.uniform(ks[3], (1, output_size), jnp.float32, -lim3, lim3),
        "bn_gamma": 1.0 + 0.1 * jax.random.normal(ks[4], (1, n), jnp.float32),
        "bn_beta": 0.1 * jax.random.normal(ks[5], (1, n), jnp.float32),
        "bn_mean": 0.1 * jax.random.normal(ks[6], (1, n), jnp.float32),
        "bn_var": 1.0 + 0.1 * jax.random.uniform(ks[7], (1, n), jnp.float32),
    }


def prepare_params(params, compute_dtype=jnp.bfloat16):
    """Host-side, one-time prep: fold eval-mode BN into linear_3 and pre-cast
    the MXU operands to the compute dtype (biases stay f32).

    BN(h) = h*scale + shift, scale = gamma/sqrt(var+eps), shift = beta - mean*scale
    => BN(h) @ W3 + b3 = h @ (scale[:,None]*W3) + (shift @ W3 + b3)
    """
    scale = params["bn_gamma"] * lax.rsqrt(params["bn_var"] + BN_EPS)   # (1, n)
    shift = params["bn_beta"] - params["bn_mean"] * scale               # (1, n)

    w3f = scale.reshape(-1, 1) * params["w3"]                           # (n, out)
    b3f = shift @ params["w3"] + params["b3"]                           # (1, out)

    return {
        "w1": params["w1"].astype(compute_dtype),
        "b1": params["b1"].astype(jnp.float32),
        "w3_folded": w3f.astype(compute_dtype),
        "b3_folded": b3f.astype(jnp.float32),
    }


# --------------------------------------------------------------------------
# Pure-JAX reference (unfolded path, f32) for correctness checking.
# --------------------------------------------------------------------------
def _reference_forward(x, p):
    h = x @ p["w1"] + p["b1"]
    h = jnp.where(h >= 0.0, h, LEAKY_SLOPE * h)
    h = (h - p["bn_mean"]) / jnp.sqrt(p["bn_var"] + BN_EPS) * p["bn_gamma"] + p["bn_beta"]
    y = h @ p["w3"] + p["b3"]
    return jax.nn.sigmoid(y) * TWO_PI


if __name__ == "__main__":
    input_size, n, output_size = 16, 32, 8
    batch = 24   # multi-step grid (tm=8, 3 steps) at a small, module-consistent shape

    key = jax.random.PRNGKey(0)
    kx, kp = jax.random.split(key)
    x = jax.random.normal(kx, (batch, input_size), jnp.float32)
    params = init_params(kp, input_size, n, output_size)

    ref = _reference_forward(x, params)

    # f32 path: tight check of kernel math + BN fold + tiling logic.
    prepared_f32 = prepare_params(params, compute_dtype=jnp.float32)
    out_f32 = jax.block_until_ready(network_1_forward(x, prepared_f32))
    np.testing.assert_allclose(np.asarray(out_f32), np.asarray(ref),
                               rtol=1e-5, atol=1e-5)

    # bf16 MXU path (default fast path): looser tolerance.
    prepared_bf16 = prepare_params(params, compute_dtype=jnp.bfloat16)
    out_bf16 = jax.block_until_ready(network_1_forward(x, prepared_bf16))
    np.testing.assert_allclose(np.asarray(out_bf16), np.asarray(ref),
                               rtol=3e-2, atol=3e-2)

    assert out_f32.shape == (batch, output_size)
    print("KERNEL_OK")
</pallas_src>

<mosaic_0001>
module attributes {stable_mosaic.version = 11 : i64} {
  func.func @_network1_kernel(%arg0: i32, %arg1: memref<8x16xf32, #tpu.memory_space<vmem>>, %arg2: memref<16x32xf32, #tpu.memory_space<vmem>>, %arg3: memref<1x32xf32, #tpu.memory_space<vmem>>, %arg4: memref<32x8xf32, #tpu.memory_space<vmem>>, %arg5: memref<1x8xf32, #tpu.memory_space<vmem>>, %arg6: memref<8x8xf32, #tpu.memory_space<vmem>>) attributes {dimension_semantics = [#tpu.dimension_semantics<parallel>], iteration_bounds = array<i64: 3>, scalar_prefetch = 0 : i64, scratch_operands = 0 : i64, tpu.core_type = #tpu.core_type<tc>, window_params = [{transform_indices = @transform_0, window_bounds = array<i64: 8, 16>}, {pipeline_mode = #tpu.pipeline_mode<synchronous>, transform_indices = @transform_1, window_bounds = array<i64: 16, 32>}, {pipeline_mode = #tpu.pipeline_mode<synchronous>, transform_indices = @transform_2, window_bounds = array<i64: 1, 32>}, {pipeline_mode = #tpu.pipeline_mode<synchronous>, transform_indices = @transform_3, window_bounds = array<i64: 32, 8>}, {pipeline_mode = #tpu.pipeline_mode<synchronous>, transform_indices = @transform_4, window_bounds = array<i64: 1, 8>}, {transform_indices = @transform_5, window_bounds = array<i64: 8, 8>}]} {
    %c0 = arith.constant 0 : index
    %c0_0 = arith.constant 0 : index
    %0 = vector.load %arg1[%c0, %c0_0] : memref<8x16xf32, #tpu.memory_space<vmem>>, vector<8x16xf32>
    %c0_1 = arith.constant 0 : index
    %c0_2 = arith.constant 0 : index
    %1 = vector.load %arg2[%c0_1, %c0_2] : memref<16x32xf32, #tpu.memory_space<vmem>>, vector<16x32xf32>
    %cst = arith.constant dense<0.000000e+00> : vector<8x32xf32>
    %2 = tpu.matmul %0, %1, %cst {dimension_numbers = #tpu.dot_dimension_numbers<[1], [0], [0], [1], [0, 0, 1, 1], [], []>} : vector<8x16xf32>, vector<16x32xf32>, vector<8x32xf32> -> vector<8x32xf32>
    %c0_3 = arith.constant 0 : index
    %c0_4 = arith.constant 0 : index
    %3 = vector.load %arg3[%c0_3, %c0_4] : memref<1x32xf32, #tpu.memory_space<vmem>>, vector<1x32xf32>
    %4 = vector.broadcast %3 : vector<1x32xf32> to vector<8x32xf32>
    %5 = arith.addf %2, %4 : vector<8x32xf32>
    %cst_5 = arith.constant 1.000000e-01 : f32
    %6 = vector.broadcast %cst_5 : f32 to vector<8x32xf32>
    %7 = arith.mulf %6, %5 : vector<8x32xf32>
    %8 = arith.maximumf %5, %7 : vector<8x32xf32>
    %c0_6 = arith.constant 0 : index
    %c0_7 = arith.constant 0 : index
    %9 = vector.load %arg4[%c0_6, %c0_7] : memref<32x8xf32, #tpu.memory_space<vmem>>, vector<32x8xf32>
    %cst_8 = arith.constant dense<0.000000e+00> : vector<8x8xf32>
    %10 = tpu.matmul %8, %9, %cst_8 {dimension_numbers = #tpu.dot_dimension_numbers<[1], [0], [0], [1], [0, 0, 1, 1], [], []>} : vector<8x32xf32>, vector<32x8xf32>, vector<8x8xf32> -> vector<8x8xf32>
    %c0_9 = arith.constant 0 : index
    %c0_10 = arith.constant 0 : index
    %11 = vector.load %arg5[%c0_9, %c0_10] : memref<1x8xf32, #tpu.memory_space<vmem>>, vector<1x8xf32>
    %12 = vector.broadcast %11 : vector<1x8xf32> to vector<8x8xf32>
    %13 = arith.addf %10, %12 : vector<8x8xf32>
    %cst_11 = arith.constant 5.000000e-01 : f32
    %14 = vector.broadcast %cst_11 : f32 to vector<8x8xf32>
    %15 = arith.mulf %14, %13 : vector<8x8xf32>
    %16 = math.tanh %15 : vector<8x8xf32>
    %cst_12 = arith.constant 1.000000e+00 : f32
    %17 = vector.broadcast %cst_12 : f32 to vector<8x8xf32>
    %18 = arith.addf %17, %16 : vector<8x8xf32>
    %cst_13 = arith.constant 3.14159274 : f32
    %19 = vector.broadcast %cst_13 : f32 to vector<8x8xf32>
    %20 = arith.mulf %19, %18 : vector<8x8xf32>
    %c0_14 = arith.constant 0 : index
    %c0_15 = arith.constant 0 : index
    %21 = vector.load %arg6[%c0_14, %c0_15] : memref<8x8xf32, #tpu.memory_space<vmem>>, vector<8x8xf32>
    tpu.vector_store %arg6[%c0_14, %c0_15], %20 {strides = array<i32>} : memref<8x8xf32, #tpu.memory_space<vmem>>, vector<8x8xf32>,
    return
  }
  func.func @transform_0(%arg0: i32) -> (i32, i32) {
    %c0_i32 = arith.constant 0 : i32
    %c0_i32_0 = arith.constant 0 : i32
    return %arg0, %c0_i32 : i32, i32
  }
  func.func @transform_1(%arg0: i32) -> (i32, i32) {
    %c0_i32 = arith.constant 0 : i32
    %c0_i32_0 = arith.constant 0 : i32
    %c0_i32_1 = arith.constant 0 : i32
    return %c0_i32, %c0_i32_0 : i32, i32
  }
  func.func @transform_2(%arg0: i32) -> (i32, i32) {
    %c0_i32 = arith.constant 0 : i32
    %c0_i32_0 = arith.constant 0 : i32
    %c0_i32_1 = arith.constant 0 : i32
    return %c0_i32, %c0_i32_0 : i32, i32
  }
  func.func @transform_3(%arg0: i32) -> (i32, i32) {
    %c0_i32 = arith.constant 0 : i32
    %c0_i32_0 = arith.constant 0 : i32
    %c0_i32_1 = arith.constant 0 : i32
    return %c0_i32, %c0_i32_0 : i32, i32
  }
  func.func @transform_4(%arg0: i32) -> (i32, i32) {
    %c0_i32 = arith.constant 0 : i32
    %c0_i32_0 = arith.constant 0 : i32
    %c0_i32_1 = arith.constant 0 : i32
    return %c0_i32, %c0_i32_0 : i32, i32
  }
  func.func @transform_5(%arg0: i32) -> (i32, i32) {
    %c0_i32 = arith.constant 0 : i32
    %c0_i32_0 = arith.constant 0 : i32
    return %arg0, %c0_i32 : i32, i32
  }
}

</mosaic_0001>

<bundles_post_ra>
// kernel: tpu_custom_call.1
= control target key start
LH: loop header
LB: loop body
LE: loop exit
PB: predicated region body
PF: predicated region fallthrough
CT: control target
= control target key end

     0   :  { %s541_s18 = smov 0   ;;  %s589_s0 = inlined_call_operand.vmem [shape: f32[24,16], index: 0, kind: input, shape index: {}]   ;;  %s590_s1 = inlined_call_operand.vmem [shape: f32[16,32], index: 1, kind: input, shape index: {}]   ;;  %s591_s2 = inlined_call_operand.vmem [shape: f32[1,32], index: 2, kind: input, shape index: {}]   ;;  %s592_s3 = inlined_call_operand.vmem [shape: f32[32,8], index: 3, kind: input, shape index: {}]   ;;  %s593_s4 = inlined_call_operand.vmem [shape: f32[1,8], index: 4, kind: input, shape index: {}]   ;;  %s594_s5 = inlined_call_operand.vmem [shape: f32[24,8], index: 5, kind: output, shape index: {}]  }
   0x1 LB: > { %s450_s19 = sadd.s32 4294967295, %s507_s18   ;;  %p454_p0 = scmp.ge.s32.totalorder %s507_s18, 1  ;;  %s507_s18 = sphi %s541_s18, %s15_s18  }
   0x2   : > { %p186_p1 = scmp.lt.s32.totalorder %s507_s18, 4 }
   0x4   : > { %p187_p2 = pnand %p454_p0, %p186_p1 }
   0x5   : > { %p212_p3 = scmp.lt.s32.totalorder (!%p187_p2), %s450_s19, 2 }
   0x6   : > { %190 = sbr.rel (%p187_p2) target bundleno = 431 (0x1af), region = 40 }
   0xb   : > { %v222_v0 = vld [vmem:[%s590_s1 + $0x8] sm:$0xff]  ;;  %v509_v1 = vmov 0.0   ;;  %v221_v2 = vld [vmem:[%s590_s1] sm:$0xff]  ;;  %vm510_vm0 = vmmov 0   ;;  %s596_s19 = smov (!%p212_p3, %s450_s19), 2  ;;  %vm230_vm1 = vcmask 130048  }
   0xc   : > { %471 = vmatprep.subr.mxu0 %v509_v1  ;;  %475 = vmatprep.mubr.msk.f32.mxu0 %vm510_vm0, %v509_v1  ;;  %s455_s24 = sshll.u32 %s596_s19, 3  ;;  %v309_v4 = vld [vmem:[%s592_s3 + $0x18] sm:$0xff]  ;;  %v308_v5 = vld [vmem:[%s592_s3 + $0x10] sm:$0xff]  ;;  %v307_v6 = vld [vmem:[%s592_s3 + $0x8] sm:$0xff]  ;;  %vm317_vm2 = vcmask 261120   ;;  %vm395_vm3 = vcmask 64512  }
   0xd   : > { %472 = vmatpush3.msra.mxu0 %v222_v0  ;;  %478 = vmatprep.subr.mxu1 %v509_v1  ;;  %s215_s27 = scalar_lea.vmem %s589_s0, %s455_s24  ;;  %v306_v7 = vld [vmem:[%s592_s3] sm:$0xff]  ;;  %s219_s17 = scalar_lea.vmem %s594_s5, %s455_s24 }
   0xe   : > { %473 = vmatprep.subr.mxu0 %v509_v1  ;;  %486 = vmatprep.mubr.msk.f32.mxu1 %vm510_vm0, %v509_v1  ;;  %v220_v3 = vld [vmem:[%s215_s27] sm:$0xff] }
   0xf   : > { %474 = vmatpush3.msra.mxu0 %v221_v2  ;;  %479 = vmatpush3.msra.mxu1 %v309_v4  ;;  %v457_v8 = vld [vmem:[%s591_s2] ss:$0 sm:$0xff] }
  0x10   : > { %476 = vmatmul.mubr.msk.f32.vlgmr.msra.gmra.mxu0 %vm230_vm1, %v220_v3  ;;  %480 = vmatprep.subr.mxu1 %v509_v1  ;;  %v459_v14 = vld [vmem:[%s593_s4] ss:$0 sm:$0xff] }
  0x11   : > { %481 = vmatpush3.msra.mxu1 %v308_v5 }
  0x12   : > { %482 = vmatprep.subr.mxu1 %v509_v1 }
  0x13   : > { %483 = vmatpush3.msra.mxu1 %v307_v6 }
  0x14   : > { %484 = vmatprep.subr.mxu1 %v509_v1 }
  0x15   : > { %485 = vmatpush3.msra.mxu1 %v306_v7 }
  0xd0   : > { %v300_v9 = vpop.f32.mrf.mxu0 }
  0xd1   : > { %v301_v10 = vadd.f32 %v457_v8, %v300_v9 }
  0xd2   : > { %v477_v11 = vpop.f32.mrf.mxu0 }
  0xd3   : > { %v304_v12 = vmul.f32 0.1, %v301_v10 }
  0xd5   : > { %v305_v13 = vmax.f32 %v301_v10, %v304_v12 }
  0xd7   : > { %487 = vmatmul.mubr.msk.f32.vlgmr.msra.gmra.mxu1 %vm317_vm2, %v305_v13 }
 0x197   : > { %v387_v15 = vpop.f32.mrf.mxu1 }
 0x198   : > { %v388_v16 = vadd.f32 %v459_v14, %v387_v15 }
 0x199   : > { %v488_v17 = vpop.f32.mrf.mxu1 }
 0x19a   : > { %v391_v18 = vmul.f32 0.5, %v388_v16 }
 0x19c   : > { %499 = vtanh.f32 %v391_v18 }
 0x1a9   : > { %v500_v19 = vpop.eup %499 }
 0x1aa   : > { %v393_v20 = vadd.f32 1.0, %v500_v19 }
 0x1ac   : > { %v394_v21 = vmul.f32 3.1415927, %v393_v20 }
 0x1ae   : > { %396 = vst.msk [vmem:[%s219_s17] sm:$0xff] %vm395_vm3, %v394_v21 }
 0x1af PF: > { %s15_s18 = sadd.s32 1, %s507_s18  }
 0x1b0   : > { %p12_p4 = scmp.ge.s32.totalorder %s15_s18, 5  }
 0x1b2   :  { %14 = sbr.rel (!%p12_p4) target bundleno = 1 (0x1), region = 70 }

</bundles_post_ra>
